<compile_context>
chip_gen: v6e
topology: v6e:2x2x1
jax: 0.10.0
libtpu: 0.0.40
codegen_flags: <defaults>
</compile_context>

<pallas_src>
import jax
import jax.numpy as jnp
from jax.experimental import pallas as pl
from jax.experimental.pallas import tpu as pltpu


def _pool_kernel(*refs):
    """refs = (*x_refs, p_ref, s_ref, o_ref).

    Each x_ref is a (rows, lanes) tile whose lane axis holds whole tap/output-column
    groups; p_ref is a small constant 0/1 pooling matrix mapping those lanes to
    output columns; s_ref is the per-row (== per-channel) conv weight.  The whole
    k*k reduction is one MXU matmul per x_ref -- no per-tap VPU multiply, no
    materialized temp, no in-kernel reshape/relayout.
    """
    *x_refs, p_ref, s_ref, o_ref = refs
    p = p_ref[...]
    acc = jnp.dot(x_refs[0][...], p, preferred_element_type=jnp.float32)
    for x_ref in x_refs[1:]:
        acc = acc + jnp.dot(x_ref[...], p, preferred_element_type=jnp.float32)
    o_ref[...] = (acc * s_ref[...]).astype(o_ref.dtype)


def _pick_pack_factor(ho, wo, k):
    """Row-pack factor r (must divide Ho so the reshape stays metadata-only).

    Only used when k*k*Wo < 128: pack r output rows into the lane axis so input
    blocks are lane-dense (and output stores as wide as the shape allows), while
    capping the per-row lane footprint so the pooling matmul stays cheap.
    """
    kw = k * k * wo
    if kw >= 128:
        return 1
    r = 1
    for d in range(2, ho + 1):
        if ho % d:
            continue
        if d * kw > 512:
            break
        r = d
        if d * kw >= 128 and d * wo >= 128:
            break
    return r


def _pick_row_tile(nrows, bytes_per_row, target_bytes):
    """Largest row tile (multiple of 8, or the full extent) whose input block is
    about `target_bytes`; trailing partial blocks are handled by a cdiv grid."""
    max_rows = int(target_bytes // max(1, bytes_per_row))
    if max_rows >= nrows or nrows <= 8:
        return int(nrows)
    return int(max(8, (max_rows // 8) * 8))


def depthwise_conv(x_nchw, w, kernel_size, *, wo_tile=128, target_block_bytes=None):
    """x_nchw: [N, C, H, W]; w: [C, 1, k, k]; returns [N, C, H//k, W//k] (NCHW).

    Matches F.conv2d(x, w, stride=k, groups=C) for this module's weights (the
    registered buffer is all ones, i.e. per-channel-uniform taps).
    """
    k = int(kernel_size)
    N, C, H, W = x_nchw.shape
    Ho, Wo = H // k, W // k
    Wc = Wo * k
    dtype = x_nchw.dtype
    itemsize = jnp.dtype(dtype).itemsize

    # stride-k VALID conv ignores trailing rows/cols (one-time strided copy only
    # for shapes where H or W is not a multiple of k).
    if H != Ho * k or W != Wc:
        x_nchw = x_nchw[:, :, : Ho * k, :Wc]

    # --- generation-aware sizing ------------------------------------------------
    try:
        vmem_cap = int(pltpu.get_tpu_info().vmem_capacity_bytes)
    except Exception:  # interpret mode / CPU AOT etc.
        vmem_cap = 64 << 20
    if target_block_bytes is None:
        # ~8 MiB input per grid step on 128 MiB parts (v5e/v6e), ~6 MiB on 64 MiB
        # parts (v7x): large enough to amortize the ~0.35us per-step overhead,
        # small enough that double-buffered in+out (+P) fits scoped VMEM easily.
        target_block_bytes = (8 << 20) if vmem_cap >= (96 << 20) else (6 << 20)

    # --- choose layout regime ----------------------------------------------------
    # NOTE: on v5e with f32 inputs a 64-wide output tile would halve the redundant
    # MACs, but 128 keeps output stores lane-dense; default left at 128.
    use_wide = (Wo > wo_tile) and (Wo % wo_tile == 0) and (wo_tile % 128 == 0)

    if use_wide:
        r = 1
        hp = Ho
        lane_block = wo_tile * k            # lanes per x block (one tap-row each)
        wt = wo_tile                        # output lanes per block (dense, 128)
        wo_blocks = Wo // wo_tile
        num_x = k
        m = jnp.arange(lane_block)
        pool = (m[:, None] // k == jnp.arange(wt)[None, :]).astype(dtype)
    else:
        kw = k * Wc                         # = k*k*Wo lanes per output row
        r = _pick_pack_factor(Ho, Wo, k)
        hp = Ho // r
        lane_block = r * kw
        wt = r * Wo
        wo_blocks = 1
        num_x = 1
        m = jnp.arange(lane_block)
        col = (m // kw) * Wo + ((m % kw) % Wc) // k
        pool = (col[:, None] == jnp.arange(wt)[None, :]).astype(dtype)

    # Flatten (C, Ho/r) into one row axis: contiguous merge, metadata only.
    R = C * hp
    x3 = x_nchw.reshape(N, R, r * k * Wc)

    # Per-channel conv weight applied as a per-row scale on the small output tile
    # (exact for this module: the registered buffer is all ones).
    # TODO(synk): weights that differ across taps within a channel would need a
    # per-tap multiply path; not needed for this module's constant ones buffer.
    scale = jnp.repeat(w.reshape(C, -1)[:, 0].astype(jnp.float32), hp).reshape(R, 1)

    bytes_per_row = num_x * lane_block * itemsize
    th = _pick_row_tile(R, bytes_per_row, target_block_bytes)
    row_blocks = pl.cdiv(R, th)
    if N * row_blocks * wo_blocks < 2 and R >= 16:
        # give a v7x megacore (2 TensorCores) at least two parallel grid steps
        th = max(8, ((th // 2) // 8) * 8)
        row_blocks = pl.cdiv(R, th)
    grid = (N, row_blocks, wo_blocks)

    if use_wide:
        x_specs = [
            pl.BlockSpec((pl.Squeezed(), th, lane_block),
                         lambda n, h, wb, a=a: (n, h, a * wo_blocks + wb))
            for a in range(k)
        ]
    else:
        x_specs = [pl.BlockSpec((pl.Squeezed(), th, lane_block),
                                lambda n, h, wb: (n, h, 0))]
    in_specs = x_specs + [
        pl.BlockSpec((lane_block, wt), lambda n, h, wb: (0, 0)),   # resident P
        pl.BlockSpec((th, 1), lambda n, h, wb: (h, 0)),            # per-row scale
    ]
    out_spec = pl.BlockSpec((pl.Squeezed(), th, wt), lambda n, h, wb: (n, h, wb))

    # VMEM budget: double-buffered inputs + outputs + resident P, plus slack.
    x_block_bytes = num_x * th * lane_block * itemsize
    out_block_bytes = th * wt * itemsize
    p_bytes = lane_block * wt * itemsize
    vmem_need = 2 * (x_block_bytes + out_block_bytes + p_bytes + th * 4) + (4 << 20)
    vmem_limit = int(min(vmem_cap * 3 // 4, max(vmem_need, 32 << 20)))

    cost = pl.CostEstimate(
        flops=int(2 * N * C * Ho * Wo * lane_block * num_x),
        transcendentals=0,
        bytes_accessed=int(x3.size * itemsize + N * C * Ho * Wo * itemsize
                           + pool.size * itemsize + scale.size * 4),
    )

    out3 = pl.pallas_call(
        _pool_kernel,
        out_shape=jax.ShapeDtypeStruct((N, R, wt * wo_blocks), dtype),
        grid_spec=pltpu.PrefetchScalarGridSpec(
            num_scalar_prefetch=0,
            grid=grid,
            in_specs=in_specs,
            out_specs=out_spec,
        ),
        compiler_params=pltpu.CompilerParams(
            dimension_semantics=("parallel", "parallel", "parallel"),
            vmem_limit_bytes=vmem_limit,
        ),
        cost_estimate=cost,
    )(*([x3] * num_x), pool, scale)

    # contiguous split back to NCHW [N, C, Ho, Wo]; no post-transpose needed
    return out3.reshape(N, C, Ho, Wo)


if __name__ == "__main__":
    num_features = 4
    kernel_size = 2
    N, H, Wdim = 2, 16, 16

    key = jax.random.PRNGKey(0)
    x = jax.random.normal(key, (N, num_features, H, Wdim), dtype=jnp.float32)

    # deterministic parameters matching the PyTorch module: all-ones buffer
    W = jnp.ones((num_features, 1, kernel_size, kernel_size), dtype=jnp.float32)

    out = depthwise_conv(x, W, kernel_size)
    out = jax.block_until_ready(out)

    # pure-JAX reference (depthwise conv, stride=k, groups=C), f32-accurate
    ref = jax.lax.conv_general_dilated(
        x, jnp.transpose(W, (2, 3, 1, 0)),  # HWIO with feature_group_count=C
        window_strides=(kernel_size, kernel_size),
        padding="VALID",
        dimension_numbers=("NCHW", "HWIO", "NCHW"),
        feature_group_count=num_features,
        precision=jax.lax.Precision.HIGHEST,
    )

    assert out.shape == (N, num_features, H // kernel_size, Wdim // kernel_size)
    assert jnp.allclose(out, ref, atol=1e-5, rtol=1e-5)
    print("KERNEL_OK")
</pallas_src>

<mosaic_0001>
module attributes {stable_mosaic.version = 11 : i64} {
  func.func @_pool_kernel(%arg0: i32, %arg1: i32, %arg2: i32, %arg3: memref<1x4x256xf32, #tpu.memory_space<vmem>>, %arg4: memref<256x64xf32, #tpu.memory_space<vmem>>, %arg5: memref<4x1xf32, #tpu.memory_space<vmem>>, %arg6: memref<1x4x64xf32, #tpu.memory_space<vmem>>) attributes {dimension_semantics = [#tpu.dimension_semantics<parallel>, #tpu.dimension_semantics<parallel>, #tpu.dimension_semantics<parallel>], iteration_bounds = array<i64: 2, 1, 1>, scalar_prefetch = 0 : i64, scratch_operands = 0 : i64, tpu.core_type = #tpu.core_type<tc>, window_params = [{transform_indices = @transform_0, window_bounds = array<i64: 1, 4, 256>}, {pipeline_mode = #tpu.pipeline_mode<synchronous>, transform_indices = @transform_1, window_bounds = array<i64: 256, 64>}, {transform_indices = @transform_2, window_bounds = array<i64: 4, 1>}, {transform_indices = @transform_3, window_bounds = array<i64: 1, 4, 64>}]} {
    %c0 = arith.constant 0 : index
    %c0_0 = arith.constant 0 : index
    %0 = vector.load %arg4[%c0, %c0_0] : memref<256x64xf32, #tpu.memory_space<vmem>>, vector<256x64xf32>
    %c0_1 = arith.constant 0 : index
    %c0_2 = arith.constant 0 : index
    %c0_3 = arith.constant 0 : index
    %1 = vector.load %arg3[%c0_1, %c0_2, %c0_3] : memref<1x4x256xf32, #tpu.memory_space<vmem>>, vector<1x4x256xf32>
    %2 = vector.shape_cast %1 : vector<1x4x256xf32> to vector<4x256xf32>
    %cst = arith.constant dense<0.000000e+00> : vector<4x64xf32>
    %3 = tpu.matmul %2, %0, %cst {dimension_numbers = #tpu.dot_dimension_numbers<[1], [0], [0], [1], [0, 0, 1, 1], [], []>} : vector<4x256xf32>, vector<256x64xf32>, vector<4x64xf32> -> vector<4x64xf32>
    %c0_4 = arith.constant 0 : index
    %c0_5 = arith.constant 0 : index
    %4 = vector.load %arg5[%c0_4, %c0_5] : memref<4x1xf32, #tpu.memory_space<vmem>>, vector<4x1xf32>
    %5 = vector.broadcast %4 : vector<4x1xf32> to vector<4x64xf32>
    %6 = arith.mulf %3, %5 : vector<4x64xf32>
    %c0_6 = arith.constant 0 : index
    %c0_7 = arith.constant 0 : index
    %c0_8 = arith.constant 0 : index
    %7 = vector.load %arg6[%c0_6, %c0_7, %c0_8] : memref<1x4x64xf32, #tpu.memory_space<vmem>>, vector<1x4x64xf32>
    %8 = vector.shape_cast %7 : vector<1x4x64xf32> to vector<4x64xf32>
    %9 = vector.shape_cast %6 : vector<4x64xf32> to vector<1x4x64xf32>
    tpu.vector_store %arg6[%c0_6, %c0_7, %c0_8], %9 {strides = array<i32>} : memref<1x4x64xf32, #tpu.memory_space<vmem>>, vector<1x4x64xf32>,
    return
  }
  func.func @transform_0(%arg0: i32, %arg1: i32, %arg2: i32) -> (i32, i32, i32) {
    %c0_i32 = arith.constant 0 : i32
    %c0_i32_0 = arith.constant 0 : i32
    return %arg0, %arg1, %c0_i32 : i32, i32, i32
  }
  func.func @transform_1(%arg0: i32, %arg1: i32, %arg2: i32) -> (i32, i32) {
    %c0_i32 = arith.constant 0 : i32
    %c0_i32_0 = arith.constant 0 : i32
    %c0_i32_1 = arith.constant 0 : i32
    return %c0_i32, %c0_i32_0 : i32, i32
  }
  func.func @transform_2(%arg0: i32, %arg1: i32, %arg2: i32) -> (i32, i32) {
    %c0_i32 = arith.constant 0 : i32
    %c0_i32_0 = arith.constant 0 : i32
    return %arg1, %c0_i32 : i32, i32
  }
  func.func @transform_3(%arg0: i32, %arg1: i32, %arg2: i32) -> (i32, i32, i32) {
    %c0_i32 = arith.constant 0 : i32
    return %arg0, %arg1, %arg2 : i32, i32, i32
  }
}

</mosaic_0001>

<bundles_post_ra>
// kernel: tpu_custom_call.1
= control target key start
LH: loop header
LB: loop body
LE: loop exit
PB: predicated region body
PF: predicated region fallthrough
CT: control target
= control target key end

     0   :  { %8 = vsyncpa [#allocation3], 0  ;;  %s855_s0 = inlined_call_operand.vmem [shape: f32[2,4,256], index: 0, kind: input, shape index: {}]   ;;  %s856_s1 = inlined_call_operand.vmem [shape: f32[256,64], index: 1, kind: input, shape index: {}]   ;;  %s857_s2 = inlined_call_operand.vmem [shape: f32[4,1], index: 2, kind: input, shape index: {}]   ;;  %s858_s3 = inlined_call_operand.hbm [shape: f32[2,4,64], index: 3, kind: output, shape index: {}]  }
   0x1   :  { %10 = vsyncpa [#allocation3 + $0x1], 0  ;;  %s657_s12 = smov 0   ;;  %s659_s13 = smov 0  }
   0x2   :  { %s661_s14 = smov 0   ;;  %s663_s15 = smov 0  }
   0x3   :  { %s665_s16 = smov 0   ;;  %s667_s17 = smov 0  }
   0x4 LB: > { %s450_s18 = sadd.s32 4294967295, %s633_s17   ;;  %s451_s19 = sadd.s32 4294967294, %s633_s17   ;;  %s633_s17 = sphi %s667_s17, %s16_s17   ;;  %s629_s16 = sphi %s665_s16, %s865_s16   ;;  %s625_s15 = sphi %s663_s15, %s864_s15   ;;  %s621_s14 = sphi %s661_s14, %s863_s14   ;;  %s617_s13 = sphi %s659_s13, %s862_s13   ;;  %s613_s12 = sphi %s657_s12, %s861_s12  }
   0x5   : > { %s35_s20 = sadd.s32 1, %s629_s16  ;;  %s121_s21 = sadd.s32 1, %s621_s14 }
   0x6   : > { %p37_p0 = scmp.ge.s32.totalorder %s35_s20, 2  ;;  %p131_p1 = scmp.ne.s32.totalorder %s621_s14, %s617_s13 }
   0x7   : > { %p132_p2 = scmp.eq.s32.totalorder %s450_s18, 1  ;;  %p137_p3 = scmp.ne.s32.totalorder %s617_s13, %s613_s12 }
   0x8   : > { %s867_s20 = smov (%p37_p0, %s35_s20), 0  ;;  %p138_p5 = scmp.eq.s32.totalorder %s451_s19, 1 }
   0x9   : > { %p697_p4 = por %p132_p2, %p131_p1  ;;  %s114_s23 = ssub.s32 %s629_s16, %s867_s20 }
   0xa   : > { %p455_p6 = scmp.ge.s32.totalorder %s633_s17, 1  ;;  %p119_p7 = scmp.eq.s32.totalorder %s114_s23, 0 }
   0xb   : > { %p704_p8 = por %p138_p5, %p137_p3  ;;  %p178_p9 = scmp.lt.s32.totalorder %s633_s17, 3 }
   0xc   : > { %s710_s25 = scalar_select %p119_p7, %s621_s14, %s121_s21  }
   0xd   : > { %p179_p10 = pnand %p455_p6, %p178_p9 }
   0xe   : > { %p210_p11 = scmp.lt.s32.totalorder (!%p179_p10), %s625_s15, 1  ;;  %s207_s29 = sand.u32 (!%p179_p10), 1, %s617_s13  }
   0xf   : > { %182 = sbr.rel (%p179_p10) target bundleno = 265 (0x109), region = 32  ;;  %s456_s30 = sshll.u32 (!%p179_p10), %s207_s29, 2 }
  0x10   : > { %s460_s4 = sshll.u32 (!%p179_p10), %s625_s15, 6  ;;  %s209_s5 = scalar_lea.vmem (!%p179_p10), [#allocation2], %s456_s30 }
  0x11   : > { %s339_s10 = scalar_lea.sflag (!%p179_p10), [#allocation3], %s207_s29  ;;  %s636_s18 = smov (!%p179_p10), [#allocation2]  }
  0x12   : > { %s561_s19 = sshll.u32 (!%p179_p10), %s636_s18, 4  ;;  %s562_s19 = int_to_ptr.vmem [resolvable:$false] %s561_s19 }
  0x14   : > { %v254_v0 = vld [vmem:[%s856_s1 + $0xf8] sm:$0xff]  ;;  %v253_v2 = vld [vmem:[%s856_s1 + $0xf0] sm:$0xff]  ;;  %v635_v4 = vmov 0   ;;  %v252_v5 = vld [vmem:[%s856_s1 + $0xe8] sm:$0xff]  ;;  %s211_s9 = scalar_select %p210_p11, %s625_s15, 1  ;;  %vm336_vm0 = vcmask 519168  }
  0x15   : > { %v238_v1 = vld [vmem:[%s856_s1 + $0x78] sm:$0xff]  ;;  %464 = vmatprep.subr.mxu0 %v254_v0  ;;  %v237_v3 = vld [vmem:[%s856_s1 + $0x70] sm:$0xff]  ;;  %555 = vset.pattern.permute.xlu0 %v635_v4  ;;  %v236_v6 = vld [vmem:[%s856_s1 + $0x68] sm:$0xff]  ;;  %s563_s15 = scalar_lea.vmem %s562_s19, 128 }
  0x16   : > { %465 = vmatpush3.msra.mxu0 %v238_v1  ;;  %v251_v7 = vld [vmem:[%s856_s1 + $0xe0] sm:$0xff]  ;;  %s463_s21 = sshll.u32 %s211_s9, 3  ;;  %v250_v9 = vld [vmem:[%s856_s1 + $0xd8] sm:$0xff]  ;;  %v249_v11 = vld [vmem:[%s856_s1 + $0xd0] sm:$0xff]  ;;  %s352_s9 = scalar_lea.hbm %s858_s3, %s460_s4 }
  0x17   : > { %466 = vmatprep.subr.mxu0 %v253_v2  ;;  %v235_v8 = vld [vmem:[%s856_s1 + $0x60] sm:$0xff]  ;;  %v234_v10 = vld [vmem:[%s856_s1 + $0x58] sm:$0xff]  ;;  %s218_s6 = scalar_lea.vmem %s855_s0, %s463_s21  ;;  %v233_v12 = vld [vmem:[%s856_s1 + $0x50] sm:$0xff] }
  0x18   : > { %467 = vmatpush3.msra.mxu0 %v237_v3  ;;  %v248_v13 = vld [vmem:[%s856_s1 + $0xc8] sm:$0xff]  ;;  %v255_v14 = vld [vmem:[%s218_s6] sm:$0xff]  ;;  %v246_v20 = vld [vmem:[%s856_s1 + $0xb8] sm:$0xff]  ;;  %s354_s6 = sshll.u32 %s209_s5, 4  ;;  %s355_s6 = int_to_ptr.vmem [resolvable:$true] %s354_s6 }
  0x19   : > { %468 = vmatprep.subr.mxu0 %v252_v5  ;;  %v232_v15 = vld [vmem:[%s856_s1 + $0x48] sm:$0xff]  ;;  %v257_v16 = vcombine.high %v255_v14, %v255_v14  ;;  %v329_v17 = vld [vmem:[%s857_s2] sm:$0xf]  ;;  %v230_v21 = vld [vmem:[%s856_s1 + $0x38] sm:$0xff]  ;;  %s557_s11 = scalar_lea.vmem %s355_s6, 64  ;;  %p564_p1 = scmp.lt.s32.totalorder %s355_s6, %s562_s19 }
  0x1a   : > { %469 = vmatpush3.msra.mxu0 %v236_v6  ;;  %v247_v18 = vld [vmem:[%s856_s1 + $0xc0] sm:$0xff]  ;;  %332 = vperm.xlu0 %555, %v329_v17   ;;  %v245_v22 = vld [vmem:[%s856_s1 + $0xb0] sm:$0xff]  ;;  %v244_v24 = vld [vmem:[%s856_s1 + $0xa8] sm:$0xff]  ;;  %p558_p12 = scmp.ne.s32.totalorder %s355_s6, %s557_s11  ;;  %p565_p2 = scmp.lt.s32.totalorder %s563_s15, %s557_s11 }
  0x1b   : > { %470 = vmatprep.subr.mxu0 %v251_v7  ;;  %v231_v19 = vld [vmem:[%s856_s1 + $0x40] sm:$0xff]  ;;  %323 = vmatprep.mubr.f32.mxu0 %v257_v16  ;;  %v229_v23 = vld [vmem:[%s856_s1 + $0x30] sm:$0xff]  ;;  %v228_v25 = vld [vmem:[%s856_s1 + $0x28] sm:$0xff] }
  0x1c   : > { %471 = vmatpush3.msra.mxu0 %v235_v8  ;;  %v243_v26 = vld [vmem:[%s856_s1 + $0xa0] sm:$0xff]  ;;  %v242_v28 = vld [vmem:[%s856_s1 + $0x98] sm:$0xff]  ;;  %v241_v30 = vld [vmem:[%s856_s1 + $0x90] sm:$0xff]  ;;  %p559_p13 = pnand %p558_p12, %p697_p4  ;;  %p566_p3 = por %p565_p2, %p564_p1 }
  0x1d   : > { %472 = vmatprep.subr.mxu0 %v250_v9  ;;  %v227_v27 = vld [vmem:[%s856_s1 + $0x20] sm:$0xff]  ;;  %v226_v29 = vld [vmem:[%s856_s1 + $0x18] sm:$0xff]  ;;  %v225_v31 = vld [vmem:[%s856_s1 + $0x10] sm:$0xff] }
  0x1e   : > { %473 = vmatpush3.msra.mxu0 %v234_v10  ;;  %v240_v32 = vld [vmem:[%s856_s1 + $0x88] sm:$0xff]  ;;  %v239_v34 = vld [vmem:[%s856_s1 + $0x80] sm:$0xff]  ;;  %p560_p0 = pneg %p559_p13 }
  0x1f   : > { %474 = vmatprep.subr.mxu0 %v249_v11  ;;  %v224_v33 = vld [vmem:[%s856_s1 + $0x8] sm:$0xff]  ;;  %v223_v35 = vld [vmem:[%s856_s1] sm:$0xff] }
  0x20   : > { %475 = vmatpush3.msra.mxu0 %v233_v12  ;;  %p567_p5 = pnand %p566_p3, %p560_p0 }
  0x21   : > { %476 = vmatprep.subr.mxu0 %v248_v13 }
  0x22   : > { %477 = vmatpush3.msra.mxu0 %v232_v15 }
  0x23   : > { %478 = vmatprep.subr.mxu0 %v247_v18 }
  0x24   : > { %479 = vmatpush3.msra.mxu0 %v231_v19 }
  0x25   : > { %480 = vmatprep.subr.mxu0 %v246_v20 }
  0x26   : > { %481 = vmatpush3.msra.mxu0 %v230_v21 }
  0x27   : > { %482 = vmatprep.subr.mxu0 %v245_v22 }
  0x28   : > { %483 = vmatpush3.msra.mxu0 %v229_v23 }
  0x29   : > { %484 = vmatprep.subr.mxu0 %v244_v24 }
  0x2a   : > { %485 = vmatpush3.msra.mxu0 %v228_v25 }
  0x2b   : > { %486 = vmatprep.subr.mxu0 %v243_v26 }
  0x2c   : > { %487 = vmatpush3.msra.mxu0 %v227_v27 }
  0x2d   : > { %488 = vmatprep.subr.mxu0 %v242_v28 }
  0x2e   : > { %489 = vmatpush3.msra.mxu0 %v226_v29 }
  0x2f   : > { %490 = vmatprep.subr.mxu0 %v241_v30 }
  0x30   : > { %491 = vmatpush3.msra.mxu0 %v225_v31 }
  0x31   : > { %492 = vmatprep.subr.mxu0 %v240_v32 }
  0x32   : > { %493 = vmatpush3.msra.mxu0 %v224_v33 }
  0x33   : > { %494 = vmatprep.subr.mxu0 %v239_v34 }
  0x34   : > { %495 = vmatpush3.msra.mxu0 %v223_v35 }
  0x35   : > { %324 = vmatmul.mubr.f32.vlgmr.msra.gmra.mxu0 %v255_v14 }
  0x95   : > { %v333_v38 = vpop.permute.xlu0 %332 }
  0xf5   : > { %v496_v36 = vpop.f32.mrf.mxu0 }
  0xf7   : > { %v497_v37 = vpop.f32.mrf.mxu0 }
  0xf8   : > { %v498_v39 = vadd.f32 %v497_v37, %v496_v36 }
  0xfa   : > { %v335_v40 = vmul.f32 %v498_v39, %v333_v38 }
  0xfc   : > { %337 = vst.msk [vmem:[%s209_s5] sm:$0xf] %vm336_vm0, %v335_v40 }
  0xfd   : > { %570 = shalt.err (!%p567_p5)
}
  0xfe   : > { %s571_s23 = scalar_lea.hbm %s352_s9, 64  ;;  %s575_s27 = scalar_lea.hbm %s858_s3, 128 }
  0xff   : > { %p572_p6 = scmp.ne.s32.totalorder %s352_s9, %s571_s23  ;;  %p576_p10 = scmp.lt.s32.totalorder %s352_s9, %s858_s3 }
 0x100   : > { %p577_p11 = scmp.lt.s32.totalorder %s575_s27, %s571_s23 }
 0x101   : > { %p573_p7 = pnand %p572_p6, %p697_p4 }
 0x102   : > { %p578_p12 = por %p577_p11, %p576_p10 }
 0x103   : > { %p574_p9 = pneg %p573_p7 }
 0x105   : > { %p579_p13 = pnand %p578_p12, %p574_p9 }
 0x107   : > { %582 = shalt.err (!%p579_p13)
}
 0x108   : > { %499 = dma.vmem_to_hbm [thread:$0]  (%p697_p4), %s355_s6, 64, %s352_s9, %s339_s10  }
 0x109 PF: > { %p505_p0 = scmp.ge.s32.totalorder %s633_s17, 2  ;;  %s366_s30 = sand.u32 1, %s613_s12  }
 0x10a   : > { %s367_s4 = scalar_lea.sflag [#allocation3], %s366_s30 }
 0x10b   : > { %p502_p1 = pnand %p505_p0, %p704_p8 }
 0x10d   : > { %p503_p2 = pneg %p502_p1 }
 0x10f   : > { %608 = dma.done.wait (%p503_p2), %s367_s4, 64  }
 0x110   : > { %610 = vsyncadd (%p503_p2), %s367_s4, 4294967232  ;;  %s16_s17 = sadd.s32 1, %s633_s17   ;;  %s861_s12 = smov %s617_s13 }
 0x111   : > { %p13_p3 = scmp.ge.s32.totalorder %s16_s17, 4   ;;  %s862_s13 = smov %s621_s14 }
 0x112   : > { %s863_s14 = smov %s710_s25  ;;  %s864_s15 = smov %s629_s16 }
 0x113   : > { %s865_s16 = smov %s867_s20  ;;  %15 = sbr.rel (!%p13_p3) target bundleno = 4 (0x4), region = 70 }
 0x118   :  { %372 = vsyncpa [#allocation3], 1 }
 0x119   :  { %374 = vsyncpa [#allocation3 + $0x1], 1 }

</bundles_post_ra>
